<compile_context>
chip_gen: v6e
topology: v6e:2x2x1
jax: 0.10.0
libtpu: 0.0.40
codegen_flags: <defaults>
</compile_context>

<pallas_src>
import math

import jax
import jax.numpy as jnp
from jax.experimental import pallas as pl
from jax.experimental.pallas import tpu as pltpu


def _matmul_bias_kernel(p_ref, w_ref, b_ref, o_ref):
    """One (batch, spatial-tile) step: o = W @ patches + b.

    p_ref: (1, CK, tile_s)    im2col patches tile (lane-dense)
    w_ref: (Cout, CK)         flattened weights, contraction order (kh, kw, ci)
    b_ref: (Cout, 1)          bias (f32)
    o_ref: (1, Cout, tile_s)  lane-dense output tile
    """
    acc = jnp.dot(w_ref[...], p_ref[0], preferred_element_type=jnp.float32)
    o_ref[0] = (acc + b_ref[...]).astype(o_ref.dtype)


def _divisors(n):
    ds = set()
    i = 1
    while i * i <= n:
        if n % i == 0:
            ds.add(i)
            ds.add(n // i)
        i += 1
    return sorted(ds)


def _vmem_capacity_bytes():
    try:
        return int(getattr(pltpu.get_tpu_info(), "vmem_capacity_bytes",
                           128 * 1024 * 1024))
    except Exception:
        return 128 * 1024 * 1024


def _pick_tile_s(S_pad, N, CK, Cout, in_bytes, out_bytes, vmem_budget,
                 prefer_many_steps):
    """Largest 128-multiple divisor of S_pad whose (double-buffered) footprint
    fits the VMEM budget; on 2-TC chips prefer >=4 total parallel grid steps."""
    cands = [d for d in _divisors(S_pad) if d % 128 == 0]
    if not cands:                      # cannot happen: S_pad is rounded to 128
        return S_pad

    def footprint(tile):
        return (2 * CK * tile * in_bytes          # double-buffered patches tile
                + 2 * Cout * tile * out_bytes     # double-buffered output tile
                + 2 * Cout * CK * in_bytes        # weights (resident)
                + 2 * Cout * 4)                   # bias

    feasible = [d for d in cands if footprint(d) <= vmem_budget]
    if not feasible:
        feasible = [cands[0]]          # smallest (128) tile always tiny in practice
    if prefer_many_steps:
        many = [d for d in feasible if N * (S_pad // d) >= 4]
        if many:
            return max(many)
    return max(feasible)


def _im2col(x_pad, KH, KW, stride, Ho, Wo):
    """(N, Cin, Hp, Wp) -> (N, KH*KW*Cin, Ho*Wo), contraction order (kh, kw, ci)."""
    N, Cin = x_pad.shape[0], x_pad.shape[1]
    taps = []
    for kh in range(KH):
        for kw in range(KW):
            taps.append(
                x_pad[:, :,
                      kh:kh + (Ho - 1) * stride + 1:stride,
                      kw:kw + (Wo - 1) * stride + 1:stride])    # (N, Cin, Ho, Wo)
    p = jnp.stack(taps, axis=1)                                 # (N, KH*KW, Cin, Ho, Wo)
    return p.reshape(N, KH * KW * Cin, Ho * Wo)


def conv_layer_forward(x_nchw, weight, bias, *, stride=1, compute_dtype=None):
    """ReflectionPad2d(K//2) + Conv2d(stride).  NCHW in / NCHW out.

    weight: (Cout, Cin, KH, KW) (PyTorch layout); bias: (Cout,).
    compute_dtype: optional cast for matmul operands (e.g. jnp.bfloat16);
      accumulation is always f32; output dtype follows the input dtype.
    """
    N, Cin, H, W = x_nchw.shape
    Cout, Cin_w, KH, KW = weight.shape
    assert Cin_w == Cin and KH == KW
    pad = KH // 2
    out_dtype = x_nchw.dtype

    # Cast BEFORE padding/im2col so the intermediates carry half the HBM bytes
    # on the bf16 path (matters most on v5e's lower HBM bandwidth).
    if compute_dtype is not None:
        x_nchw = x_nchw.astype(compute_dtype)
        weight = weight.astype(compute_dtype)

    # Reflection pad + im2col in the wrapper; the kernel does zero relayout.
    x_pad = jnp.pad(x_nchw, ((0, 0), (0, 0), (pad, pad), (pad, pad)),
                    mode="reflect")
    Hp, Wp = H + 2 * pad, W + 2 * pad
    Ho = (Hp - KH) // stride + 1
    Wo = (Wp - KW) // stride + 1
    S = Ho * Wo
    CK = KH * KW * Cin

    patches = _im2col(x_pad, KH, KW, stride, Ho, Wo)            # (N, CK, S)

    # Pad the flattened spatial axis to a multiple of 128 so every store is a
    # full-lane vst; the padded columns are sliced off after the kernel.
    S_pad = -(-S // 128) * 128
    if S_pad != S:
        patches = jnp.pad(patches, ((0, 0), (0, 0), (0, S_pad - S)))

    # (Cout, Cin, KH, KW) -> (Cout, KH*KW*Cin), order (kh, kw, ci) matching
    # the tap order in _im2col.
    w2 = jnp.transpose(weight, (0, 2, 3, 1)).reshape(Cout, CK)
    b2 = bias.reshape(Cout, 1).astype(jnp.float32)

    in_bytes = patches.dtype.itemsize
    out_bytes = jnp.dtype(out_dtype).itemsize

    # Generation-aware VMEM budget: ~40 MiB on v7x (64 MiB/TC), ~80 MiB on
    # v5e/v6e (128 MiB).  The <=64 MiB case is also the 2-TC (v7x) case, where
    # we prefer >=4 parallel grid steps so both TensorCores get work.
    vmem_cap = _vmem_capacity_bytes()
    vmem_limit = int(min(vmem_cap * 5 // 8, 100 * 1024 * 1024))
    prefer_many_steps = vmem_cap <= 64 * 1024 * 1024
    tile_s = _pick_tile_s(S_pad, N, CK, Cout, in_bytes, out_bytes,
                          vmem_budget=vmem_limit // 2,
                          prefer_many_steps=prefer_many_steps)
    num_tiles = S_pad // tile_s

    cost = pl.CostEstimate(
        flops=2 * N * Cout * CK * S_pad,
        transcendentals=0,
        bytes_accessed=(N * CK * S_pad * in_bytes
                        + Cout * CK * in_bytes
                        + N * Cout * S_pad * out_bytes),
    )

    out = pl.pallas_call(
        _matmul_bias_kernel,
        out_shape=jax.ShapeDtypeStruct((N, Cout, S_pad), out_dtype),
        grid=(N, num_tiles),
        in_specs=[
            # Streamed, double-buffered patches tile (lane-dense).
            pl.BlockSpec((1, CK, tile_s), lambda n, t: (n, 0, t)),
            # Grid-invariant weights / bias (stay resident).
            pl.BlockSpec((Cout, CK), lambda n, t: (0, 0)),
            pl.BlockSpec((Cout, 1), lambda n, t: (0, 0)),
        ],
        out_specs=pl.BlockSpec((1, Cout, tile_s), lambda n, t: (n, 0, t)),
        compiler_params=pltpu.CompilerParams(
            dimension_semantics=("parallel", "parallel"),
            vmem_limit_bytes=vmem_limit,
        ),
        cost_estimate=cost,
    )(patches, w2, b2)

    if S_pad != S:
        out = out[:, :, :S]
    # (N, Cout, Ho*Wo) -> (N, Cout, Ho, Wo): contiguous, metadata-only reshape.
    return out.reshape(N, Cout, Ho, Wo)


if __name__ == "__main__":
    key = jax.random.PRNGKey(0)
    k_x, k_w, k_b = jax.random.split(key, 3)

    # ConvLayer(in_channels=4, out_channels=8, kernel_size=3, stride=1)
    N, Cin, H, W = 2, 4, 16, 16
    Cout, K, stride = 8, 3, 1

    x = jax.random.normal(k_x, (N, Cin, H, W), dtype=jnp.float32)
    fan_in = Cin * K * K
    bound = 1.0 / float(math.sqrt(fan_in))
    weight = jax.random.uniform(k_w, (Cout, Cin, K, K), jnp.float32, -bound, bound)
    bias = jax.random.uniform(k_b, (Cout,), jnp.float32, -bound, bound)

    out = conv_layer_forward(x, weight, bias, stride=stride)
    out = jax.block_until_ready(out)

    # Reference: reflection pad + VALID conv via XLA.
    pad = K // 2
    x_pad_ref = jnp.pad(x, ((0, 0), (0, 0), (pad, pad), (pad, pad)),
                        mode="reflect")
    ref = jax.lax.conv_general_dilated(
        x_pad_ref, weight, window_strides=(stride, stride), padding="VALID",
        dimension_numbers=("NCHW", "OIHW", "NCHW"),
    ) + bias.reshape(1, Cout, 1, 1)
    assert out.shape == ref.shape == (N, Cout, H, W)
    assert jnp.allclose(out, ref, atol=1e-4, rtol=1e-4), \
        float(jnp.max(jnp.abs(out - ref)))

    # bf16 MXU-operand path (f32 accumulation) — looser tolerance.
    out_bf16 = conv_layer_forward(x, weight, bias, stride=stride,
                                  compute_dtype=jnp.bfloat16)
    out_bf16 = jax.block_until_ready(out_bf16)
    assert jnp.allclose(out_bf16, ref, atol=5e-2, rtol=5e-2)

    # stride=2 path (exercises the strided im2col + spatial padding fallback).
    out_s2 = conv_layer_forward(x, weight, bias, stride=2)
    out_s2 = jax.block_until_ready(out_s2)
    ref_s2 = jax.lax.conv_general_dilated(
        x_pad_ref, weight, window_strides=(2, 2), padding="VALID",
        dimension_numbers=("NCHW", "OIHW", "NCHW"),
    ) + bias.reshape(1, Cout, 1, 1)
    assert jnp.allclose(out_s2, ref_s2, atol=1e-4, rtol=1e-4)

    print("KERNEL_OK")
</pallas_src>

<mosaic_0001>
module attributes {stable_mosaic.version = 11 : i64} {
  func.func @_matmul_bias_kernel(%arg0: i32, %arg1: i32, %arg2: memref<1x36x256xf32, #tpu.memory_space<vmem>>, %arg3: memref<8x36xf32, #tpu.memory_space<vmem>>, %arg4: memref<8x1xf32, #tpu.memory_space<vmem>>, %arg5: memref<1x8x256xf32, #tpu.memory_space<vmem>>) attributes {dimension_semantics = [#tpu.dimension_semantics<parallel>, #tpu.dimension_semantics<parallel>], iteration_bounds = array<i64: 2, 1>, scalar_prefetch = 0 : i64, scratch_operands = 0 : i64, tpu.core_type = #tpu.core_type<tc>, window_params = [{transform_indices = @transform_0, window_bounds = array<i64: 1, 36, 256>}, {pipeline_mode = #tpu.pipeline_mode<synchronous>, transform_indices = @transform_1, window_bounds = array<i64: 8, 36>}, {pipeline_mode = #tpu.pipeline_mode<synchronous>, transform_indices = @transform_2, window_bounds = array<i64: 8, 1>}, {transform_indices = @transform_3, window_bounds = array<i64: 1, 8, 256>}]} {
    %c0 = arith.constant 0 : index
    %c0_0 = arith.constant 0 : index
    %0 = vector.load %arg3[%c0, %c0_0] : memref<8x36xf32, #tpu.memory_space<vmem>>, vector<8x36xf32>
    %c0_1 = arith.constant 0 : index
    %c0_2 = arith.constant 0 : index
    %c0_3 = arith.constant 0 : index
    %1 = vector.load %arg2[%c0_1, %c0_2, %c0_3] : memref<1x36x256xf32, #tpu.memory_space<vmem>>, vector<1x36x256xf32>
    %2 = vector.shape_cast %1 : vector<1x36x256xf32> to vector<36x256xf32>
    %cst = arith.constant dense<0.000000e+00> : vector<8x256xf32>
    %3 = tpu.matmul %0, %2, %cst {dimension_numbers = #tpu.dot_dimension_numbers<[1], [0], [0], [1], [0, 0, 1, 1], [], []>} : vector<8x36xf32>, vector<36x256xf32>, vector<8x256xf32> -> vector<8x256xf32>
    %c0_4 = arith.constant 0 : index
    %c0_5 = arith.constant 0 : index
    %4 = vector.load %arg4[%c0_4, %c0_5] : memref<8x1xf32, #tpu.memory_space<vmem>>, vector<8x1xf32>
    %5 = vector.broadcast %4 : vector<8x1xf32> to vector<8x256xf32>
    %6 = arith.addf %3, %5 : vector<8x256xf32>
    %c0_6 = arith.constant 0 : index
    %c0_7 = arith.constant 0 : index
    %c0_8 = arith.constant 0 : index
    %7 = vector.load %arg5[%c0_6, %c0_7, %c0_8] : memref<1x8x256xf32, #tpu.memory_space<vmem>>, vector<1x8x256xf32>
    %8 = vector.shape_cast %7 : vector<1x8x256xf32> to vector<8x256xf32>
    %9 = vector.shape_cast %6 : vector<8x256xf32> to vector<1x8x256xf32>
    tpu.vector_store %arg5[%c0_6, %c0_7, %c0_8], %9 {strides = array<i32>} : memref<1x8x256xf32, #tpu.memory_space<vmem>>, vector<1x8x256xf32>,
    return
  }
  func.func @transform_0(%arg0: i32, %arg1: i32) -> (i32, i32, i32) {
    %c0_i32 = arith.constant 0 : i32
    %c0_i32_0 = arith.constant 0 : i32
    return %arg0, %c0_i32, %arg1 : i32, i32, i32
  }
  func.func @transform_1(%arg0: i32, %arg1: i32) -> (i32, i32) {
    %c0_i32 = arith.constant 0 : i32
    %c0_i32_0 = arith.constant 0 : i32
    %c0_i32_1 = arith.constant 0 : i32
    return %c0_i32, %c0_i32_0 : i32, i32
  }
  func.func @transform_2(%arg0: i32, %arg1: i32) -> (i32, i32) {
    %c0_i32 = arith.constant 0 : i32
    %c0_i32_0 = arith.constant 0 : i32
    %c0_i32_1 = arith.constant 0 : i32
    return %c0_i32, %c0_i32_0 : i32, i32
  }
  func.func @transform_3(%arg0: i32, %arg1: i32) -> (i32, i32, i32) {
    %c0_i32 = arith.constant 0 : i32
    %c0_i32_0 = arith.constant 0 : i32
    return %arg0, %c0_i32, %arg1 : i32, i32, i32
  }
}

</mosaic_0001>

<bundles_post_ra>
// kernel: tpu_custom_call.1
= control target key start
LH: loop header
LB: loop body
LE: loop exit
PB: predicated region body
PF: predicated region fallthrough
CT: control target
= control target key end

     0   :  { %8 = vsyncpa [#allocation3], 0  ;;  %s675_s0 = inlined_call_operand.vmem [shape: f32[2,36,256], index: 0, kind: input, shape index: {}]   ;;  %s676_s1 = inlined_call_operand.vmem [shape: f32[8,36], index: 1, kind: input, shape index: {}]   ;;  %s677_s2 = inlined_call_operand.vmem [shape: f32[8,1], index: 2, kind: input, shape index: {}]   ;;  %s678_s3 = inlined_call_operand.hbm [shape: f32[2,8,256], index: 3, kind: output, shape index: {}]  }
   0x1   :  { %10 = vsyncpa [#allocation3 + $0x1], 0  ;;  %s570_s12 = smov 0   ;;  %s572_s13 = smov 0  }
   0x2   :  { %s574_s14 = smov 0   ;;  %s576_s15 = smov 0  }
   0x3   :  { %s578_s16 = smov 0   ;;  %s580_s17 = smov 0  }
   0x4 LB: > { %s394_s18 = sadd.s32 4294967295, %s545_s17   ;;  %s395_s19 = sadd.s32 4294967294, %s545_s17   ;;  %s545_s17 = sphi %s580_s17, %s16_s17   ;;  %s541_s16 = sphi %s578_s16, %s685_s16   ;;  %s537_s15 = sphi %s576_s15, %s684_s15   ;;  %s533_s14 = sphi %s574_s14, %s683_s14   ;;  %s529_s13 = sphi %s572_s13, %s682_s13   ;;  %s525_s12 = sphi %s570_s12, %s681_s12  }
   0x5   : > { %s28_s20 = sadd.s32 1, %s541_s16  ;;  %s107_s21 = sadd.s32 1, %s533_s14 }
   0x6   : > { %p30_p0 = scmp.ge.s32.totalorder %s28_s20, 2  ;;  %p117_p1 = scmp.ne.s32.totalorder %s533_s14, %s529_s13 }
   0x7   : > { %p118_p2 = scmp.eq.s32.totalorder %s394_s18, 1  ;;  %p123_p3 = scmp.ne.s32.totalorder %s529_s13, %s525_s12 }
   0x8   : > { %s687_s20 = smov (%p30_p0, %s28_s20), 0  ;;  %p124_p5 = scmp.eq.s32.totalorder %s395_s19, 1 }
   0x9   : > { %p610_p4 = por %p118_p2, %p117_p1  ;;  %s102_s23 = ssub.s32 %s541_s16, %s687_s20 }
   0xa   : > { %p398_p6 = scmp.ge.s32.totalorder %s545_s17, 1  ;;  %p105_p7 = scmp.eq.s32.totalorder %s102_s23, 0 }
   0xb   : > { %p617_p8 = por %p124_p5, %p123_p3  ;;  %p161_p9 = scmp.lt.s32.totalorder %s545_s17, 3 }
   0xc   : > { %s623_s25 = scalar_select %p105_p7, %s533_s14, %s107_s21  }
   0xd   : > { %p162_p10 = pnand %p398_p6, %p161_p9 }
   0xe   : > { %p190_p11 = scmp.lt.s32.totalorder (!%p162_p10), %s537_s15, 1  ;;  %s186_s8 = sand.u32 (!%p162_p10), 1, %s529_s13  }
   0xf   : > { %165 = sbr.rel (%p162_p10) target bundleno = 246 (0xf6), region = 32  ;;  %s399_s9 = sshll.u32 (!%p162_p10), %s186_s8, 4 }
  0x10   : > { %s409_s10 = sshll.u32 (!%p162_p10), %s537_s15, 8  ;;  %s188_s11 = scalar_lea.vmem (!%p162_p10), [#allocation2], %s399_s9 }
  0x11   : > { %s318_s18 = sshll.u32 (!%p162_p10), %s188_s11, 4  ;;  %s316_s23 = scalar_lea.hbm (!%p162_p10), %s678_s3, %s409_s10  ;;  %s319_s18 = int_to_ptr.vmem [resolvable:$true] %s318_s18 }
  0x12   : > { %s302_s26 = scalar_lea.sflag (!%p162_p10), [#allocation3], %s186_s8  ;;  %s469_s27 = scalar_lea.vmem (!%p162_p10), %s319_s18, 256 }
  0x13   : > { %p470_p12 = scmp.ne.s32.totalorder (!%p162_p10), %s319_s18, %s469_s27 }
  0x14   : > { %v547_v0 = vmov 0.0   ;;  %v548_v1 = vmov 0   ;;  %v211_v2 = vld [vmem:[%s677_s2] sm:$0xff]  ;;  %s191_s28 = scalar_select %p190_p11, %s537_s15, 1  ;;  %vm221_vm0 = vcmask 1043456   ;;  %vm217_vm1 = vcmask 293888  }
  0x15   : > { %292 = vmatprep.mubr.f32.mxu0 %v547_v0  ;;  %468 = vset.pattern.permute.xlu0 %v548_v1  ;;  %v200_v13 = vld [vmem:[%s676_s1] sm:$0xff]  ;;  %p471_p13 = pnand %p470_p12, %p610_p4 }
  0x16   : > { %214 = vperm.xlu0 %468, %v211_v2   ;;  %s410_s29 = smul.u32 80, %s191_s28  ;;  %s549_s28 = smov [#allocation2]  }
  0x17   : > { %p472_p0 = pneg %p471_p13  ;;  %s473_s15 = sshll.u32 %s549_s28, 4  ;;  %s474_s15 = int_to_ptr.vmem [resolvable:$false] %s473_s15 }
  0x18   : > { %s197_s5 = scalar_lea.vmem %s675_s0, %s410_s29  ;;  %s475_s29 = scalar_lea.vmem %s474_s15, 512 }
  0x19   : > { %v210_v3 = vld [vmem:[%s197_s5 + $0x48] sm:$0xf]  ;;  %v209_v4 = vld [vmem:[%s197_s5 + $0x40] sm:$0xf]  ;;  %v208_v5 = vld [vmem:[%s197_s5 + $0x38] sm:$0xff]  ;;  %p476_p1 = scmp.lt.s32.totalorder %s319_s18, %s474_s15  ;;  %p477_p2 = scmp.lt.s32.totalorder %s475_s29, %s469_s27 }
  0x1a   : > { %401 = vmatprep.subr.msk.mxu0 %vm221_vm0, %v210_v3  ;;  %v207_v6 = vld [vmem:[%s197_s5 + $0x30] sm:$0xff]  ;;  %v206_v7 = vld [vmem:[%s197_s5 + $0x28] sm:$0xff]  ;;  %v205_v8 = vld [vmem:[%s197_s5 + $0x20] sm:$0xff] }
  0x1b   : > { %402 = vmatpush1.msk.msra.mxu0 %vm221_vm0, %v209_v4  ;;  %v204_v9 = vld [vmem:[%s197_s5 + $0x18] sm:$0xff]  ;;  %v203_v10 = vld [vmem:[%s197_s5 + $0x10] sm:$0xff]  ;;  %v202_v11 = vld [vmem:[%s197_s5 + $0x8] sm:$0xff]  ;;  %p478_p3 = por %p477_p2, %p476_p1 }
  0x1c   : > { %252 = vmatprep.subr.mxu0 %v208_v5  ;;  %v201_v12 = vld [vmem:[%s197_s5] sm:$0xff] }
  0x1d   : > { %253 = vmatpush1.msra.mxu0 %v207_v6  ;;  %p479_p5 = pnand %p478_p3, %p472_p0 }
  0x1e   : > { %254 = vmatprep.subr.mxu0 %v206_v7 }
  0x1f   : > { %255 = vmatpush1.msra.mxu0 %v205_v8 }
  0x20   : > { %256 = vmatprep.subr.mxu0 %v204_v9 }
  0x21   : > { %257 = vmatpush1.msra.mxu0 %v203_v10 }
  0x22   : > { %258 = vmatprep.subr.mxu0 %v202_v11 }
  0x23   : > { %259 = vmatpush1.msra.mxu0 %v201_v12 }
  0x24   : > { %403 = vmatmul.mubr.msk.f32.vlgmr.msra.gmra.mxu0 %vm217_vm1, %v200_v13 }
  0x91   : > { %v215_v14 = vpop.permute.xlu0 %214 }
  0xe4   : > { %v294_v15 = vpop.f32.mrf.mxu0 }
  0xe5   : > { %v295_v16 = vadd.f32 %v294_v15, %v215_v14 }
  0xe6   : > { %v296_v17 = vpop.f32.mrf.mxu0 }
  0xe7   : > { %299 = vst [vmem:[%s188_s11] sm:$0xff] %v295_v16  ;;  %v297_v18 = vadd.f32 %v296_v17, %v215_v14 }
  0xe9   : > { %300 = vst [vmem:[%s188_s11 + $0x8] sm:$0xff] %v297_v18 }
  0xea   : > { %482 = shalt.err (!%p479_p5)
}
  0xeb   : > { %s483_s30 = scalar_lea.hbm %s316_s23, 256  ;;  %s487_s6 = scalar_lea.hbm %s678_s3, 512 }
  0xec   : > { %p484_p6 = scmp.ne.s32.totalorder %s316_s23, %s483_s30  ;;  %p488_p10 = scmp.lt.s32.totalorder %s316_s23, %s678_s3 }
  0xed   : > { %p489_p11 = scmp.lt.s32.totalorder %s487_s6, %s483_s30 }
  0xee   : > { %p485_p7 = pnand %p484_p6, %p610_p4 }
  0xef   : > { %p490_p12 = por %p489_p11, %p488_p10 }
  0xf0   : > { %p486_p9 = pneg %p485_p7 }
  0xf2   : > { %p491_p13 = pnand %p490_p12, %p486_p9 }
  0xf4   : > { %494 = shalt.err (!%p491_p13)
}
  0xf5   : > { %411 = dma.vmem_to_hbm [thread:$0]  (%p610_p4), %s319_s18, 256, %s316_s23, %s302_s26  }
  0xf6 PF: > { %p417_p0 = scmp.ge.s32.totalorder %s545_s17, 2  ;;  %s330_s9 = sand.u32 1, %s525_s12  }
  0xf7   : > { %s331_s10 = scalar_lea.sflag [#allocation3], %s330_s9 }
  0xf8   : > { %p414_p1 = pnand %p417_p0, %p617_p8 }
  0xfa   : > { %p415_p2 = pneg %p414_p1 }
  0xfc   : > { %520 = dma.done.wait (%p415_p2), %s331_s10, 256  }
  0xfd   : > { %522 = vsyncadd (%p415_p2), %s331_s10, 4294967040  ;;  %s16_s17 = sadd.s32 1, %s545_s17   ;;  %s681_s12 = smov %s529_s13 }
  0xfe   : > { %p13_p3 = scmp.ge.s32.totalorder %s16_s17, 4   ;;  %s682_s13 = smov %s533_s14 }
  0xff   : > { %s683_s14 = smov %s623_s25  ;;  %s684_s15 = smov %s541_s16 }
 0x100   : > { %s685_s16 = smov %s687_s20  ;;  %15 = sbr.rel (!%p13_p3) target bundleno = 4 (0x4), region = 67 }
 0x105   :  { %336 = vsyncpa [#allocation3], 1 }
 0x106   :  { %338 = vsyncpa [#allocation3 + $0x1], 1 }

</bundles_post_ra>
